<compile_context>
chip_gen: v7x
topology: tpu7x:2x2x1
jax: 0.10.0
libtpu: 0.0.40
codegen_flags: <defaults>
</compile_context>

<pallas_src>
import functools
import math

import jax
import jax.numpy as jnp
from jax import lax
from jax.experimental import pallas as pl
from jax.experimental.pallas import tpu as pltpu


# Large finite negative instead of -inf: identical result here (the diagonal is
# always unmasked) and robust if this is ever generalized to padded rows.
_MASK_VALUE = -1e30


def _attention_group_kernel(x_ref, mask_ref, wq_ref, wk_ref, wv_ref, bqkv_ref,
                            wproj_ref, bproj_ref, o_ref, acc_ref, *,
                            group_heads, head_dim):
    """One grid step = (batch b, head-group g).

    Blocks:
      x_ref:     (1, T, C)          current batch row
      mask_ref:  (T, T)   f32       additive causal mask (0 / -1e30), resident
      wq/wk/wv:  (NG, C, G*D)       per-group projection columns, resident
      bqkv_ref:  (NG, 3, G*D) f32   packed q/k/v bias, resident
      wproj_ref: (H, D, C)          per-head rows of the output projection, resident
      bproj_ref: (1, C)   f32       resident
      o_ref:     (1, T, C)          written once, at the last head-group step
      acc_ref:   (T, C)   f32       VMEM scratch accumulator
    """
    g = pl.program_id(1)
    last_g = pl.num_programs(1) - 1

    dot_dtype = wq_ref.dtype                # bf16 on the fast path, f32 otherwise
    x = x_ref[0]                            # (T, C) in compute dtype
    scale = 1.0 / math.sqrt(head_dim)

    # Wide (G*D-lane) projection matmuls for this head group, f32 accumulate.
    # Softmax scale is folded into q (a T*G*D multiply, not a T*T one).
    wq = wq_ref[g]                          # (C, G*D)
    wk = wk_ref[g]
    wv = wv_ref[g]
    bias = bqkv_ref[g]                      # (3, G*D) f32

    q = (jnp.dot(x, wq, preferred_element_type=jnp.float32) + bias[0:1, :]) * scale
    k = jnp.dot(x, wk, preferred_element_type=jnp.float32) + bias[1:2, :]
    v = jnp.dot(x, wv, preferred_element_type=jnp.float32) + bias[2:3, :]

    mask = mask_ref[...]                    # (T, T) f32 additive bias

    # Per-head attention inside the group (static, unrolled loop — score and
    # PV matmuls are inherently per-head on the MXU).  Head merge + output
    # projection with NO lane-axis concatenate:
    #   concat_h(y_h) @ W_proj == sum_h y_h @ W_proj[h*D:(h+1)*D, :]
    contrib = jnp.zeros(acc_ref.shape, jnp.float32)            # (T, C)
    for i in range(group_heads):
        lo = i * head_dim
        q_i = q[:, lo:lo + head_dim].astype(dot_dtype)         # (T, D)
        k_i = k[:, lo:lo + head_dim].astype(dot_dtype)
        v_i = v[:, lo:lo + head_dim].astype(dot_dtype)

        # Scores: contract the head dim directly (no materialized transpose).
        s = lax.dot_general(q_i, k_i, (((1,), (1,)), ((), ())),
                            preferred_element_type=jnp.float32)  # (T, T)
        s = s + mask

        # Numerically stable softmax, all f32; divide on the EUP slot.
        m = jnp.max(s, axis=-1, keepdims=True)
        e = jnp.exp(s - m)
        den = jnp.sum(e, axis=-1, keepdims=True)
        p = (e * pl.reciprocal(den, approx=True)).astype(dot_dtype)

        y_i = jnp.dot(p, v_i, preferred_element_type=jnp.float32)    # (T, D)
        w_pr = wproj_ref[g * group_heads + i]                        # (D, C)
        contrib = contrib + jnp.dot(y_i.astype(dot_dtype), w_pr,
                                    preferred_element_type=jnp.float32)

    @pl.when(g == 0)
    def _init():
        acc_ref[...] = contrib + bproj_ref[...]

    @pl.when(g != 0)
    def _accumulate():
        acc_ref[...] = acc_ref[...] + contrib

    @pl.when(g == last_g)
    def _finalize():
        o_ref[0] = acc_ref[...].astype(o_ref.dtype)


def _pick_group_size(n_heads, head_dim, target_lanes=256):
    """Smallest divisor G of n_heads with G*head_dim >= target_lanes, else n_heads."""
    for g in range(1, n_heads + 1):
        if n_heads % g == 0 and g * head_dim >= target_lanes:
            return g
    return n_heads


def self_attention(x, w_qkv, b_qkv, w_proj, b_proj, *, n_heads,
                   compute_dtype=jnp.bfloat16):
    """Causal multi-head self-attention (GPT-2 style).

    x: (B, T, C); w_qkv: (C, 3C); b_qkv: (3C,); w_proj: (C, C); b_proj: (C,).
    Matmuls run in `compute_dtype` (bf16 by default, the MXU fast path) with
    f32 accumulation; softmax and the output accumulator are f32.
    """
    B, T, C = x.shape
    H = n_heads
    assert C % H == 0
    D = C // H
    G = _pick_group_size(H, D)
    NG = H // G
    GD = G * D

    # ---- wrapper-side weight preprocessing (tiny, one-time in a real model) ----
    w_q, w_k, w_v = jnp.split(w_qkv, 3, axis=1)                 # (C, C) each

    def group_cols(w):  # (C, C) -> (NG, C, G*D); group g = heads [g*G, (g+1)*G)
        return jnp.transpose(w.reshape(C, NG, GD), (1, 0, 2)).astype(compute_dtype)

    wq_g, wk_g, wv_g = group_cols(w_q), group_cols(w_k), group_cols(w_v)

    b_q, b_k, b_v = jnp.split(b_qkv, 3)
    bqkv_g = jnp.stack([b_q.reshape(NG, GD), b_k.reshape(NG, GD),
                        b_v.reshape(NG, GD)], axis=1).astype(jnp.float32)  # (NG,3,GD)

    wproj_h = w_proj.reshape(H, D, C).astype(compute_dtype)     # (H, D, C)
    bproj2 = b_proj.reshape(1, C).astype(jnp.float32)

    # Additive causal mask: 0 on/below the diagonal, -1e30 above. Resident.
    causal = jnp.tril(jnp.ones((T, T), dtype=bool))
    mask = jnp.where(causal, 0.0, _MASK_VALUE).astype(jnp.float32)

    x_c = x.astype(compute_dtype)

    wbytes = jnp.dtype(compute_dtype).itemsize
    flops = B * (8 * T * C * C + 4 * T * T * C)
    transcendentals = B * H * (T * T + T)
    bytes_accessed = (B * T * C * wbytes                 # x (compute dtype)
                      + B * T * C * x.dtype.itemsize     # output
                      + 4 * C * C * wbytes               # weights, fetched once
                      + 4 * C * 4                        # biases (f32)
                      + T * T * 4)                       # additive mask (f32)

    kernel = functools.partial(_attention_group_kernel,
                               group_heads=G, head_dim=D)

    return pl.pallas_call(
        kernel,
        out_shape=jax.ShapeDtypeStruct((B, T, C), x.dtype),
        grid_spec=pltpu.PrefetchScalarGridSpec(
            num_scalar_prefetch=0,
            grid=(B, NG),
            in_specs=[
                pl.BlockSpec((1, T, C), lambda b, g: (b, 0, 0)),     # x
                pl.BlockSpec((T, T), lambda b, g: (0, 0)),           # causal mask
                pl.BlockSpec((NG, C, GD), lambda b, g: (0, 0, 0)),   # W_q (resident)
                pl.BlockSpec((NG, C, GD), lambda b, g: (0, 0, 0)),   # W_k (resident)
                pl.BlockSpec((NG, C, GD), lambda b, g: (0, 0, 0)),   # W_v (resident)
                pl.BlockSpec((NG, 3, GD), lambda b, g: (0, 0, 0)),   # qkv bias (resident)
                pl.BlockSpec((H, D, C), lambda b, g: (0, 0, 0)),     # W_proj (resident)
                pl.BlockSpec((1, C), lambda b, g: (0, 0)),           # b_proj (resident)
            ],
            out_specs=pl.BlockSpec((1, T, C), lambda b, g: (b, 0, 0)),
            scratch_shapes=[pltpu.VMEM((T, C), jnp.float32)],        # f32 accumulator
        ),
        compiler_params=pltpu.CompilerParams(
            dimension_semantics=("parallel", "arbitrary")),
        cost_estimate=pl.CostEstimate(
            flops=flops,
            transcendentals=transcendentals,
            bytes_accessed=bytes_accessed),
    )(x_c, mask, wq_g, wk_g, wv_g, bqkv_g, wproj_h, bproj2)


def _reference(x, w_qkv, b_qkv, w_proj, b_proj, n_heads):
    # Pure-JAX reference mirroring the PyTorch forward.
    B, T, C = x.shape
    D = C // n_heads
    qkv = x @ w_qkv + b_qkv
    q, k, v = jnp.split(qkv, 3, axis=2)
    q = q.reshape(B, T, n_heads, D).transpose(0, 2, 1, 3)
    k = k.reshape(B, T, n_heads, D).transpose(0, 2, 1, 3)
    v = v.reshape(B, T, n_heads, D).transpose(0, 2, 1, 3)
    att = (q @ jnp.swapaxes(k, -2, -1)) * (1.0 / math.sqrt(D))
    m = jnp.tril(jnp.ones((T, T), dtype=bool))
    att = jnp.where(m[None, None], att, -jnp.inf)
    att = jax.nn.softmax(att, axis=-1)
    y = (att @ v).transpose(0, 2, 1, 3).reshape(B, T, C)
    return y @ w_proj + b_proj


if __name__ == "__main__":
    # Small config consistent with the module: n_embds=32, n_heads=4,
    # context_length=8, batch=2.
    B, T, C, H = 2, 8, 32, 4

    key = jax.random.PRNGKey(0)
    kx, k1, k2, k3, k4 = jax.random.split(key, 5)

    x = jax.random.normal(kx, (B, T, C), dtype=jnp.float32)

    bound = 1.0 / math.sqrt(C)
    w_qkv = jax.random.uniform(k1, (C, 3 * C), jnp.float32, -bound, bound)
    b_qkv = jax.random.uniform(k2, (3 * C,), jnp.float32, -bound, bound)
    w_proj = jax.random.uniform(k3, (C, C), jnp.float32, -bound, bound)
    b_proj = jax.random.uniform(k4, (C,), jnp.float32, -bound, bound)

    ref = _reference(x, w_qkv, b_qkv, w_proj, b_proj, H)

    # f32 compute path: only error source is the EUP approximate reciprocal.
    out_f32 = self_attention(x, w_qkv, b_qkv, w_proj, b_proj, n_heads=H,
                             compute_dtype=jnp.float32)
    out_f32 = jax.block_until_ready(out_f32)
    assert out_f32.shape == (B, T, C)
    err32 = float(jnp.max(jnp.abs(out_f32 - ref)))
    assert jnp.allclose(out_f32, ref, atol=5e-3, rtol=5e-3), f"f32 max abs err {err32}"

    # bf16 compute path (MXU fast path); softmax / accumulation remain f32.
    out_bf16 = self_attention(x, w_qkv, b_qkv, w_proj, b_proj, n_heads=H,
                              compute_dtype=jnp.bfloat16)
    out_bf16 = jax.block_until_ready(out_bf16)
    assert out_bf16.shape == (B, T, C)
    err16 = float(jnp.max(jnp.abs(out_bf16 - ref)))
    assert jnp.allclose(out_bf16, ref, atol=3e-2, rtol=3e-2), f"bf16 max abs err {err16}"

    print("KERNEL_OK")
</pallas_src>

<mosaic_0001>
module attributes {stable_mosaic.version = 11 : i64} {
  func.func @_attention_group_kernel(%arg0: i32, %arg1: i32, %arg2: memref<1x8x32xf32, #tpu.memory_space<vmem>>, %arg3: memref<8x8xf32, #tpu.memory_space<vmem>>, %arg4: memref<1x32x32xf32, #tpu.memory_space<vmem>>, %arg5: memref<1x32x32xf32, #tpu.memory_space<vmem>>, %arg6: memref<1x32x32xf32, #tpu.memory_space<vmem>>, %arg7: memref<1x3x32xf32, #tpu.memory_space<vmem>>, %arg8: memref<4x8x32xf32, #tpu.memory_space<vmem>>, %arg9: memref<1x32xf32, #tpu.memory_space<vmem>>, %arg10: memref<1x8x32xf32, #tpu.memory_space<vmem>>, %arg11: memref<8x32xf32, #tpu.memory_space<vmem>>) attributes {dimension_semantics = [#tpu.dimension_semantics<parallel>, #tpu.dimension_semantics<arbitrary>], iteration_bounds = array<i64: 2, 1>, scalar_prefetch = 0 : i64, scratch_operands = 1 : i64, tpu.core_type = #tpu.core_type<tc>, window_params = [{transform_indices = @transform_0, window_bounds = array<i64: 1, 8, 32>}, {pipeline_mode = #tpu.pipeline_mode<synchronous>, transform_indices = @transform_1, window_bounds = array<i64: 8, 8>}, {pipeline_mode = #tpu.pipeline_mode<synchronous>, transform_indices = @transform_2, window_bounds = array<i64: 1, 32, 32>}, {pipeline_mode = #tpu.pipeline_mode<synchronous>, transform_indices = @transform_3, window_bounds = array<i64: 1, 32, 32>}, {pipeline_mode = #tpu.pipeline_mode<synchronous>, transform_indices = @transform_4, window_bounds = array<i64: 1, 32, 32>}, {pipeline_mode = #tpu.pipeline_mode<synchronous>, transform_indices = @transform_5, window_bounds = array<i64: 1, 3, 32>}, {pipeline_mode = #tpu.pipeline_mode<synchronous>, transform_indices = @transform_6, window_bounds = array<i64: 4, 8, 32>}, {pipeline_mode = #tpu.pipeline_mode<synchronous>, transform_indices = @transform_7, window_bounds = array<i64: 1, 32>}, {transform_indices = @transform_8, window_bounds = array<i64: 1, 8, 32>}]} {
    %c0 = arith.constant 0 : index
    %c0_0 = arith.constant 0 : index
    %c0_1 = arith.constant 0 : index
    %0 = vector.load %arg2[%c0, %c0_0, %c0_1] : memref<1x8x32xf32, #tpu.memory_space<vmem>>, vector<1x8x32xf32>
    %1 = vector.shape_cast %0 : vector<1x8x32xf32> to vector<8x32xf32>
    %2 = arith.index_cast %arg1 : i32 to index
    %c0_2 = arith.constant 0 : index
    %c0_3 = arith.constant 0 : index
    %3 = vector.load %arg4[%2, %c0_2, %c0_3] : memref<1x32x32xf32, #tpu.memory_space<vmem>>, vector<1x32x32xf32>
    %4 = vector.shape_cast %3 : vector<1x32x32xf32> to vector<32x32xf32>
    %5 = arith.index_cast %arg1 : i32 to index
    %c0_4 = arith.constant 0 : index
    %c0_5 = arith.constant 0 : index
    %6 = vector.load %arg5[%5, %c0_4, %c0_5] : memref<1x32x32xf32, #tpu.memory_space<vmem>>, vector<1x32x32xf32>
    %7 = vector.shape_cast %6 : vector<1x32x32xf32> to vector<32x32xf32>
    %8 = arith.index_cast %arg1 : i32 to index
    %c0_6 = arith.constant 0 : index
    %c0_7 = arith.constant 0 : index
    %9 = vector.load %arg6[%8, %c0_6, %c0_7] : memref<1x32x32xf32, #tpu.memory_space<vmem>>, vector<1x32x32xf32>
    %10 = vector.shape_cast %9 : vector<1x32x32xf32> to vector<32x32xf32>
    %11 = arith.index_cast %arg1 : i32 to index
    %c0_8 = arith.constant 0 : index
    %c0_9 = arith.constant 0 : index
    %12 = vector.load %arg7[%11, %c0_8, %c0_9] : memref<1x3x32xf32, #tpu.memory_space<vmem>>, vector<1x3x32xf32>
    %13 = vector.shape_cast %12 : vector<1x3x32xf32> to vector<3x32xf32>
    %cst = arith.constant dense<0.000000e+00> : vector<8x32xf32>
    %14 = tpu.matmul %1, %4, %cst {dimension_numbers = #tpu.dot_dimension_numbers<[1], [0], [0], [1], [0, 0, 1, 1], [], []>} : vector<8x32xf32>, vector<32x32xf32>, vector<8x32xf32> -> vector<8x32xf32>
    %15 = vector.extract_strided_slice %13 {offsets = [0, 0], sizes = [1, 32], strides = [1, 1]} : vector<3x32xf32> to vector<1x32xf32>
    %16 = vector.broadcast %15 : vector<1x32xf32> to vector<8x32xf32>
    %17 = arith.addf %14, %16 : vector<8x32xf32>
    %cst_10 = arith.constant 0.353553385 : f32
    %18 = vector.broadcast %cst_10 : f32 to vector<8x32xf32>
    %19 = arith.mulf %17, %18 : vector<8x32xf32>
    %cst_11 = arith.constant dense<0.000000e+00> : vector<8x32xf32>
    %20 = tpu.matmul %1, %7, %cst_11 {dimension_numbers = #tpu.dot_dimension_numbers<[1], [0], [0], [1], [0, 0, 1, 1], [], []>} : vector<8x32xf32>, vector<32x32xf32>, vector<8x32xf32> -> vector<8x32xf32>
    %21 = vector.extract_strided_slice %13 {offsets = [1, 0], sizes = [1, 32], strides = [1, 1]} : vector<3x32xf32> to vector<1x32xf32>
    %22 = vector.broadcast %21 : vector<1x32xf32> to vector<8x32xf32>
    %23 = arith.addf %20, %22 : vector<8x32xf32>
    %cst_12 = arith.constant dense<0.000000e+00> : vector<8x32xf32>
    %24 = tpu.matmul %1, %10, %cst_12 {dimension_numbers = #tpu.dot_dimension_numbers<[1], [0], [0], [1], [0, 0, 1, 1], [], []>} : vector<8x32xf32>, vector<32x32xf32>, vector<8x32xf32> -> vector<8x32xf32>
    %25 = vector.extract_strided_slice %13 {offsets = [2, 0], sizes = [1, 32], strides = [1, 1]} : vector<3x32xf32> to vector<1x32xf32>
    %26 = vector.broadcast %25 : vector<1x32xf32> to vector<8x32xf32>
    %27 = arith.addf %24, %26 : vector<8x32xf32>
    %c0_13 = arith.constant 0 : index
    %c0_14 = arith.constant 0 : index
    %28 = vector.load %arg3[%c0_13, %c0_14] : memref<8x8xf32, #tpu.memory_space<vmem>>, vector<8x8xf32>
    %cst_15 = arith.constant 0.000000e+00 : f32
    %29 = vector.broadcast %cst_15 : f32 to vector<8x32xf32>
    %30 = vector.extract_strided_slice %19 {offsets = [0, 0], sizes = [8, 8], strides = [1, 1]} : vector<8x32xf32> to vector<8x8xf32>
    %31 = vector.extract_strided_slice %23 {offsets = [0, 0], sizes = [8, 8], strides = [1, 1]} : vector<8x32xf32> to vector<8x8xf32>
    %32 = vector.extract_strided_slice %27 {offsets = [0, 0], sizes = [8, 8], strides = [1, 1]} : vector<8x32xf32> to vector<8x8xf32>
    %cst_16 = arith.constant dense<0.000000e+00> : vector<8x8xf32>
    %33 = tpu.matmul %30, %31, %cst_16 {dimension_numbers = #tpu.dot_dimension_numbers<[1], [1], [0], [0], [0, 0, 1, 0], [], []>} : vector<8x8xf32>, vector<8x8xf32>, vector<8x8xf32> -> vector<8x8xf32>
    %34 = arith.addf %33, %28 : vector<8x8xf32>
    %cst_17 = arith.constant dense<0xFF800000> : vector<8xf32>
    %35 = vector.multi_reduction <maximumf>, %34, %cst_17 [1] : vector<8x8xf32> to vector<8xf32>
    %36 = vector.shape_cast %35 : vector<8xf32> to vector<8x1xf32>
    %37 = vector.broadcast %36 : vector<8x1xf32> to vector<8x8xf32>
    %38 = arith.subf %34, %37 : vector<8x8xf32>
    %39 = math.exp %38 : vector<8x8xf32>
    %cst_18 = arith.constant dense<0.000000e+00> : vector<8xf32>
    %40 = vector.multi_reduction <add>, %39, %cst_18 [1] : vector<8x8xf32> to vector<8xf32>
    %41 = vector.shape_cast %40 : vector<8xf32> to vector<8x1xf32>
    %42 = tpu.reciprocal %41 {approx = true} : vector<8x1xf32> -> vector<8x1xf32>
    %43 = vector.broadcast %42 : vector<8x1xf32> to vector<8x8xf32>
    %44 = arith.mulf %39, %43 : vector<8x8xf32>
    %cst_19 = arith.constant dense<0.000000e+00> : vector<8x8xf32>
    %45 = tpu.matmul %44, %32, %cst_19 {dimension_numbers = #tpu.dot_dimension_numbers<[1], [0], [0], [1], [0, 0, 1, 1], [], []>} : vector<8x8xf32>, vector<8x8xf32>, vector<8x8xf32> -> vector<8x8xf32>
    %c4_i32 = arith.constant 4 : i32
    %46 = arith.muli %arg1, %c4_i32 : i32
    %c0_i32 = arith.constant 0 : i32
    %47 = arith.addi %46, %c0_i32 : i32
    %48 = arith.index_cast %47 : i32 to index
    %c0_20 = arith.constant 0 : index
    %c0_21 = arith.constant 0 : index
    %49 = vector.load %arg8[%48, %c0_20, %c0_21] : memref<4x8x32xf32, #tpu.memory_space<vmem>>, vector<1x8x32xf32>
    %50 = vector.shape_cast %49 : vector<1x8x32xf32> to vector<8x32xf32>
    %cst_22 = arith.constant dense<0.000000e+00> : vector<8x32xf32>
    %51 = tpu.matmul %45, %50, %cst_22 {dimension_numbers = #tpu.dot_dimension_numbers<[1], [0], [0], [1], [0, 0, 1, 1], [], []>} : vector<8x8xf32>, vector<8x32xf32>, vector<8x32xf32> -> vector<8x32xf32>
    %52 = arith.addf %29, %51 : vector<8x32xf32>
    %53 = vector.extract_strided_slice %19 {offsets = [0, 8], sizes = [8, 8], strides = [1, 1]} : vector<8x32xf32> to vector<8x8xf32>
    %54 = vector.extract_strided_slice %23 {offsets = [0, 8], sizes = [8, 8], strides = [1, 1]} : vector<8x32xf32> to vector<8x8xf32>
    %55 = vector.extract_strided_slice %27 {offsets = [0, 8], sizes = [8, 8], strides = [1, 1]} : vector<8x32xf32> to vector<8x8xf32>
    %cst_23 = arith.constant dense<0.000000e+00> : vector<8x8xf32>
    %56 = tpu.matmul %53, %54, %cst_23 {dimension_numbers = #tpu.dot_dimension_numbers<[1], [1], [0], [0], [0, 0, 1, 0], [], []>} : vector<8x8xf32>, vector<8x8xf32>, vector<8x8xf32> -> vector<8x8xf32>
    %57 = arith.addf %56, %28 : vector<8x8xf32>
    %cst_24 = arith.constant dense<0xFF800000> : vector<8xf32>
    %58 = vector.multi_reduction <maximumf>, %57, %cst_24 [1] : vector<8x8xf32> to vector<8xf32>
    %59 = vector.shape_cast %58 : vector<8xf32> to vector<8x1xf32>
    %60 = vector.broadcast %59 : vector<8x1xf32> to vector<8x8xf32>
    %61 = arith.subf %57, %60 : vector<8x8xf32>
    %62 = math.exp %61 : vector<8x8xf32>
    %cst_25 = arith.constant dense<0.000000e+00> : vector<8xf32>
    %63 = vector.multi_reduction <add>, %62, %cst_25 [1] : vector<8x8xf32> to vector<8xf32>
    %64 = vector.shape_cast %63 : vector<8xf32> to vector<8x1xf32>
    %65 = tpu.reciprocal %64 {approx = true} : vector<8x1xf32> -> vector<8x1xf32>
    %66 = vector.broadcast %65 : vector<8x1xf32> to vector<8x8xf32>
    %67 = arith.mulf %62, %66 : vector<8x8xf32>
    %cst_26 = arith.constant dense<0.000000e+00> : vector<8x8xf32>
    %68 = tpu.matmul %67, %55, %cst_26 {dimension_numbers = #tpu.dot_dimension_numbers<[1], [0], [0], [1], [0, 0, 1, 1], [], []>} : vector<8x8xf32>, vector<8x8xf32>, vector<8x8xf32> -> vector<8x8xf32>
    %c4_i32_27 = arith.constant 4 : i32
    %69 = arith.muli %arg1, %c4_i32_27 : i32
    %c1_i32 = arith.constant 1 : i32
    %70 = arith.addi %69, %c1_i32 : i32
    %71 = arith.index_cast %70 : i32 to index
    %c0_28 = arith.constant 0 : index
    %c0_29 = arith.constant 0 : index
    %72 = vector.load %arg8[%71, %c0_28, %c0_29] : memref<4x8x32xf32, #tpu.memory_space<vmem>>, vector<1x8x32xf32>
    %73 = vector.shape_cast %72 : vector<1x8x32xf32> to vector<8x32xf32>
    %cst_30 = arith.constant dense<0.000000e+00> : vector<8x32xf32>
    %74 = tpu.matmul %68, %73, %cst_30 {dimension_numbers = #tpu.dot_dimension_numbers<[1], [0], [0], [1], [0, 0, 1, 1], [], []>} : vector<8x8xf32>, vector<8x32xf32>, vector<8x32xf32> -> vector<8x32xf32>
    %75 = arith.addf %52, %74 : vector<8x32xf32>
    %76 = vector.extract_strided_slice %19 {offsets = [0, 16], sizes = [8, 8], strides = [1, 1]} : vector<8x32xf32> to vector<8x8xf32>
    %77 = vector.extract_strided_slice %23 {offsets = [0, 16], sizes = [8, 8], strides = [1, 1]} : vector<8x32xf32> to vector<8x8xf32>
    %78 = vector.extract_strided_slice %27 {offsets = [0, 16], sizes = [8, 8], strides = [1, 1]} : vector<8x32xf32> to vector<8x8xf32>
    %cst_31 = arith.constant dense<0.000000e+00> : vector<8x8xf32>
    %79 = tpu.matmul %76, %77, %cst_31 {dimension_numbers = #tpu.dot_dimension_numbers<[1], [1], [0], [0], [0, 0, 1, 0], [], []>} : vector<8x8xf32>, vector<8x8xf32>, vector<8x8xf32> -> vector<8x8xf32>
    %80 = arith.addf %79, %28 : vector<8x8xf32>
    %cst_32 = arith.constant dense<0xFF800000> : vector<8xf32>
    %81 = vector.multi_reduction <maximumf>, %80, %cst_32 [1] : vector<8x8xf32> to vector<8xf32>
    %82 = vector.shape_cast %81 : vector<8xf32> to vector<8x1xf32>
    %83 = vector.broadcast %82 : vector<8x1xf32> to vector<8x8xf32>
    %84 = arith.subf %80, %83 : vector<8x8xf32>
    %85 = math.exp %84 : vector<8x8xf32>
    %cst_33 = arith.constant dense<0.000000e+00> : vector<8xf32>
    %86 = vector.multi_reduction <add>, %85, %cst_33 [1] : vector<8x8xf32> to vector<8xf32>
    %87 = vector.shape_cast %86 : vector<8xf32> to vector<8x1xf32>
    %88 = tpu.reciprocal %87 {approx = true} : vector<8x1xf32> -> vector<8x1xf32>
    %89 = vector.broadcast %88 : vector<8x1xf32> to vector<8x8xf32>
    %90 = arith.mulf %85, %89 : vector<8x8xf32>
    %cst_34 = arith.constant dense<0.000000e+00> : vector<8x8xf32>
    %91 = tpu.matmul %90, %78, %cst_34 {dimension_numbers = #tpu.dot_dimension_numbers<[1], [0], [0], [1], [0, 0, 1, 1], [], []>} : vector<8x8xf32>, vector<8x8xf32>, vector<8x8xf32> -> vector<8x8xf32>
    %c4_i32_35 = arith.constant 4 : i32
    %92 = arith.muli %arg1, %c4_i32_35 : i32
    %c2_i32 = arith.constant 2 : i32
    %93 = arith.addi %92, %c2_i32 : i32
    %94 = arith.index_cast %93 : i32 to index
    %c0_36 = arith.constant 0 : index
    %c0_37 = arith.constant 0 : index
    %95 = vector.load %arg8[%94, %c0_36, %c0_37] : memref<4x8x32xf32, #tpu.memory_space<vmem>>, vector<1x8x32xf32>
    %96 = vector.shape_cast %95 : vector<1x8x32xf32> to vector<8x32xf32>
    %cst_38 = arith.constant dense<0.000000e+00> : vector<8x32xf32>
    %97 = tpu.matmul %91, %96, %cst_38 {dimension_numbers = #tpu.dot_dimension_numbers<[1], [0], [0], [1], [0, 0, 1, 1], [], []>} : vector<8x8xf32>, vector<8x32xf32>, vector<8x32xf32> -> vector<8x32xf32>
    %98 = arith.addf %75, %97 : vector<8x32xf32>
    %99 = vector.extract_strided_slice %19 {offsets = [0, 24], sizes = [8, 8], strides = [1, 1]} : vector<8x32xf32> to vector<8x8xf32>
    %100 = vector.extract_strided_slice %23 {offsets = [0, 24], sizes = [8, 8], strides = [1, 1]} : vector<8x32xf32> to vector<8x8xf32>
    %101 = vector.extract_strided_slice %27 {offsets = [0, 24], sizes = [8, 8], strides = [1, 1]} : vector<8x32xf32> to vector<8x8xf32>
    %cst_39 = arith.constant dense<0.000000e+00> : vector<8x8xf32>
    %102 = tpu.matmul %99, %100, %cst_39 {dimension_numbers = #tpu.dot_dimension_numbers<[1], [1], [0], [0], [0, 0, 1, 0], [], []>} : vector<8x8xf32>, vector<8x8xf32>, vector<8x8xf32> -> vector<8x8xf32>
    %103 = arith.addf %102, %28 : vector<8x8xf32>
    %cst_40 = arith.constant dense<0xFF800000> : vector<8xf32>
    %104 = vector.multi_reduction <maximumf>, %103, %cst_40 [1] : vector<8x8xf32> to vector<8xf32>
    %105 = vector.shape_cast %104 : vector<8xf32> to vector<8x1xf32>
    %106 = vector.broadcast %105 : vector<8x1xf32> to vector<8x8xf32>
    %107 = arith.subf %103, %106 : vector<8x8xf32>
    %108 = math.exp %107 : vector<8x8xf32>
    %cst_41 = arith.constant dense<0.000000e+00> : vector<8xf32>
    %109 = vector.multi_reduction <add>, %108, %cst_41 [1] : vector<8x8xf32> to vector<8xf32>
    %110 = vector.shape_cast %109 : vector<8xf32> to vector<8x1xf32>
    %111 = tpu.reciprocal %110 {approx = true} : vector<8x1xf32> -> vector<8x1xf32>
    %112 = vector.broadcast %111 : vector<8x1xf32> to vector<8x8xf32>
    %113 = arith.mulf %108, %112 : vector<8x8xf32>
    %cst_42 = arith.constant dense<0.000000e+00> : vector<8x8xf32>
    %114 = tpu.matmul %113, %101, %cst_42 {dimension_numbers = #tpu.dot_dimension_numbers<[1], [0], [0], [1], [0, 0, 1, 1], [], []>} : vector<8x8xf32>, vector<8x8xf32>, vector<8x8xf32> -> vector<8x8xf32>
    %c4_i32_43 = arith.constant 4 : i32
    %115 = arith.muli %arg1, %c4_i32_43 : i32
    %c3_i32 = arith.constant 3 : i32
    %116 = arith.addi %115, %c3_i32 : i32
    %117 = arith.index_cast %116 : i32 to index
    %c0_44 = arith.constant 0 : index
    %c0_45 = arith.constant 0 : index
    %118 = vector.load %arg8[%117, %c0_44, %c0_45] : memref<4x8x32xf32, #tpu.memory_space<vmem>>, vector<1x8x32xf32>
    %119 = vector.shape_cast %118 : vector<1x8x32xf32> to vector<8x32xf32>
    %cst_46 = arith.constant dense<0.000000e+00> : vector<8x32xf32>
    %120 = tpu.matmul %114, %119, %cst_46 {dimension_numbers = #tpu.dot_dimension_numbers<[1], [0], [0], [1], [0, 0, 1, 1], [], []>} : vector<8x8xf32>, vector<8x32xf32>, vector<8x32xf32> -> vector<8x32xf32>
    %121 = arith.addf %98, %120 : vector<8x32xf32>
    %c0_i32_47 = arith.constant 0 : i32
    %122 = arith.cmpi eq, %arg1, %c0_i32_47 : i32
    %123 = arith.extui %122 : i1 to i32
    %c0_i32_48 = arith.constant 0 : i32
    %124 = arith.cmpi ne, %123, %c0_i32_48 : i32
    scf.if %124 {
      %c0_53 = arith.constant 0 : index
      %c0_54 = arith.constant 0 : index
      %131 = vector.load %arg9[%c0_53, %c0_54] : memref<1x32xf32, #tpu.memory_space<vmem>>, vector<1x32xf32>
      %132 = vector.broadcast %131 : vector<1x32xf32> to vector<8x32xf32>
      %133 = arith.addf %121, %132 : vector<8x32xf32>
      %c0_55 = arith.constant 0 : index
      %c0_56 = arith.constant 0 : index
      %134 = vector.load %arg11[%c0_55, %c0_56] : memref<8x32xf32, #tpu.memory_space<vmem>>, vector<8x32xf32>
      tpu.vector_store %arg11[%c0_55, %c0_56], %133 {strides = array<i32>} : memref<8x32xf32, #tpu.memory_space<vmem>>, vector<8x32xf32>,
    } else {
    }
    %c0_i32_49 = arith.constant 0 : i32
    %125 = arith.cmpi ne, %arg1, %c0_i32_49 : i32
    %126 = arith.extui %125 : i1 to i32
    %c0_i32_50 = arith.constant 0 : i32
    %127 = arith.cmpi ne, %126, %c0_i32_50 : i32
    scf.if %127 {
      %c0_53 = arith.constant 0 : index
      %c0_54 = arith.constant 0 : index
      %131 = vector.load %arg11[%c0_53, %c0_54] : memref<8x32xf32, #tpu.memory_space<vmem>>, vector<8x32xf32>
      %132 = arith.addf %131, %121 : vector<8x32xf32>
      %c0_55 = arith.constant 0 : index
      %c0_56 = arith.constant 0 : index
      %133 = vector.load %arg11[%c0_55, %c0_56] : memref<8x32xf32, #tpu.memory_space<vmem>>, vector<8x32xf32>
      tpu.vector_store %arg11[%c0_55, %c0_56], %132 {strides = array<i32>} : memref<8x32xf32, #tpu.memory_space<vmem>>, vector<8x32xf32>,
    } else {
    }
    %c0_i32_51 = arith.constant 0 : i32
    %128 = arith.cmpi eq, %arg1, %c0_i32_51 : i32
    %129 = arith.extui %128 : i1 to i32
    %c0_i32_52 = arith.constant 0 : i32
    %130 = arith.cmpi ne, %129, %c0_i32_52 : i32
    scf.if %130 {
      %c0_53 = arith.constant 0 : index
      %c0_54 = arith.constant 0 : index
      %131 = vector.load %arg11[%c0_53, %c0_54] : memref<8x32xf32, #tpu.memory_space<vmem>>, vector<8x32xf32>
      %c0_55 = arith.constant 0 : index
      %c0_56 = arith.constant 0 : index
      %c0_57 = arith.constant 0 : index
      %132 = vector.load %arg10[%c0_55, %c0_56, %c0_57] : memref<1x8x32xf32, #tpu.memory_space<vmem>>, vector<1x8x32xf32>
      %133 = vector.shape_cast %132 : vector<1x8x32xf32> to vector<8x32xf32>
      %134 = vector.shape_cast %131 : vector<8x32xf32> to vector<1x8x32xf32>
      tpu.vector_store %arg10[%c0_55, %c0_56, %c0_57], %134 {strides = array<i32>} : memref<1x8x32xf32, #tpu.memory_space<vmem>>, vector<1x8x32xf32>,
    } else {
    }
    return
  }
  func.func @transform_0(%arg0: i32, %arg1: i32) -> (i32, i32, i32) {
    %c0_i32 = arith.constant 0 : i32
    %c0_i32_0 = arith.constant 0 : i32
    %c0_i32_1 = arith.constant 0 : i32
    return %arg0, %c0_i32, %c0_i32_0 : i32, i32, i32
  }
  func.func @transform_1(%arg0: i32, %arg1: i32) -> (i32, i32) {
    %c0_i32 = arith.constant 0 : i32
    %c0_i32_0 = arith.constant 0 : i32
    %c0_i32_1 = arith.constant 0 : i32
    return %c0_i32, %c0_i32_0 : i32, i32
  }
  func.func @transform_2(%arg0: i32, %arg1: i32) -> (i32, i32, i32) {
    %c0_i32 = arith.constant 0 : i32
    %c0_i32_0 = arith.constant 0 : i32
    %c0_i32_1 = arith.constant 0 : i32
    %c0_i32_2 = arith.constant 0 : i32
    return %c0_i32, %c0_i32_0, %c0_i32_1 : i32, i32, i32
  }
  func.func @transform_3(%arg0: i32, %arg1: i32) -> (i32, i32, i32) {
    %c0_i32 = arith.constant 0 : i32
    %c0_i32_0 = arith.constant 0 : i32
    %c0_i32_1 = arith.constant 0 : i32
    %c0_i32_2 = arith.constant 0 : i32
    return %c0_i32, %c0_i32_0, %c0_i32_1 : i32, i32, i32
  }
  func.func @transform_4(%arg0: i32, %arg1: i32) -> (i32, i32, i32) {
    %c0_i32 = arith.constant 0 : i32
    %c0_i32_0 = arith.constant 0 : i32
    %c0_i32_1 = arith.constant 0 : i32
    %c0_i32_2 = arith.constant 0 : i32
    return %c0_i32, %c0_i32_0, %c0_i32_1 : i32, i32, i32
  }
  func.func @transform_5(%arg0: i32, %arg1: i32) -> (i32, i32, i32) {
    %c0_i32 = arith.constant 0 : i32
    %c0_i32_0 = arith.constant 0 : i32
    %c0_i32_1 = arith.constant 0 : i32
    %c0_i32_2 = arith.constant 0 : i32
    return %c0_i32, %c0_i32_0, %c0_i32_1 : i32, i32, i32
  }
  func.func @transform_6(%arg0: i32, %arg1: i32) -> (i32, i32, i32) {
    %c0_i32 = arith.constant 0 : i32
    %c0_i32_0 = arith.constant 0 : i32
    %c0_i32_1 = arith.constant 0 : i32
    %c0_i32_2 = arith.constant 0 : i32
    return %c0_i32, %c0_i32_0, %c0_i32_1 : i32, i32, i32
  }
  func.func @transform_7(%arg0: i32, %arg1: i32) -> (i32, i32) {
    %c0_i32 = arith.constant 0 : i32
    %c0_i32_0 = arith.constant 0 : i32
    %c0_i32_1 = arith.constant 0 : i32
    return %c0_i32, %c0_i32_0 : i32, i32
  }
  func.func @transform_8(%arg0: i32, %arg1: i32) -> (i32, i32, i32) {
    %c0_i32 = arith.constant 0 : i32
    %c0_i32_0 = arith.constant 0 : i32
    %c0_i32_1 = arith.constant 0 : i32
    return %arg0, %c0_i32, %c0_i32_0 : i32, i32, i32
  }
}

</mosaic_0001>

<bundles_post_ra>
// kernel: tpu_custom_call.1
= control target key start
LH: loop header
LB: loop body
LE: loop exit
PB: predicated region body
PF: predicated region fallthrough
CT: control target
= control target key end

     0   :  { %s2814_s0 = inlined_call_operand.hbm [shape: f32[2,8,32], index: 0, kind: input, shape index: {}]   ;;  %s2815_s1 = inlined_call_operand.vmem [shape: f32[8,8], index: 1, kind: input, shape index: {}]   ;;  %s2816_s2 = inlined_call_operand.hbm [shape: f32[1,32,32], index: 2, kind: input, shape index: {}]   ;;  %s2817_s3 = inlined_call_operand.hbm [shape: f32[1,32,32], index: 3, kind: input, shape index: {}]   ;;  %s2818_s4 = inlined_call_operand.hbm [shape: f32[1,32,32], index: 4, kind: input, shape index: {}]   ;;  %s2819_s5 = inlined_call_operand.vmem [shape: f32[1,3,32], index: 5, kind: input, shape index: {}]   ;;  %s2820_s6 = inlined_call_operand.hbm [shape: f32[4,8,32], index: 6, kind: input, shape index: {}]   ;;  %s2821_s7 = inlined_call_operand.vmem [shape: f32[1,32], index: 7, kind: input, shape index: {}]   ;;  %s2822_s8 = inlined_call_operand.hbm [shape: f32[2,8,32], index: 8, kind: output, shape index: {}]  }
   0x1   :  { %2829 = sst [smem:[#allocation17_spill]] %s2816_s2 }
   0x2   :  { %2830 = sst [smem:[#allocation18_spill]] %s2821_s7 }
   0x3   :  { %2831 = sst [smem:[#allocation19_spill]] %s2822_s8 }
   0x4   :  { %13 = vsyncpa [#allocation4], 0 }
   0x5   :  { %15 = vsyncpa [#allocation4 + $0x1], 0 }
   0x6   :  { %16 = vsyncpa [#allocation7], 0 }
   0x7   :  { %17 = vsyncpa [#allocation10], 0 }
   0x8   :  { %18 = vsyncpa [#allocation5], 0 }
   0x9   :  { %20 = vsyncpa [#allocation5 + $0x1], 0  ;;  %s2396_s27 = smov 0   ;;  %s2398_s28 = smov 0  }
   0xa   :  { %s2400_s29 = smov 0   ;;  %s2402_s30 = smov 0  }
   0xb   :  { %s2404_s9 = smov 0   ;;  %s2406_s10 = smov 0  }
   0xc LB: > { %s2823_s11 = sadd.s32 4294967295, %s2335_s10   ;;  %p1784_p0 = scmp.ge.s32.totalorder %s2335_s10, 1  ;;  %s2335_s10 = sphi %s2406_s10, %s26_s10   ;;  %s2331_s9 = sphi %s2404_s9, %s2855_s9   ;;  %s2327_s30 = sphi %s2402_s30, %s2854_s30   ;;  %s2323_s29 = sphi %s2400_s29, %s2853_s29   ;;  %s2319_s28 = sphi %s2398_s28, %s2852_s28   ;;  %s2315_s27 = sphi %s2396_s27, %s2851_s27  }
   0xd   : > { %p2430_p1 = scmp.eq.s32.totalorder %s2823_s11, 0  ;;  %p242_p2 = scmp.lt.s32.totalorder %s2335_s10, 3 }
   0xe   : > { %s2337_s14 = smov [#allocation6]   ;;  %s2338_s17 = smov [#allocation9]  }
   0xf   : > { %s2832_s12 = scalar_select %p2430_p1, 1, 0 }
  0x10   : > { %p2435_p3 = pnand %p1784_p0, %p242_p2  ;;  %s257_s15 = sshll.u32 %s2337_s14, 4  ;;  %s2439_s15 = int_to_ptr.vmem [resolvable:$true] %s257_s15 }
  0x11   : > { %s283_s18 = sshll.u32 %s2338_s17, 4  ;;  %s2339_s19 = smov [#allocation8]   ;;  %s2450_s18 = int_to_ptr.vmem [resolvable:$true] %s283_s18 }
  0x12   : > { %s2833_s13 = scalar_select %p2435_p3, 1, 0 }
  0x13   : > { %p1996_p4 = pneg %p2435_p3  ;;  %s2452_s20 = sshll.u32 %s2339_s19, 4  ;;  %s271_s20 = int_to_ptr.vmem [resolvable:$true] %s2452_s20 }
  0x14   : > { %s2835_s2 = sld [smem:[#allocation17_spill]] }
  0x15   : > { %p2446_p6 = pnand %p1996_p4, %p2430_p1 }
  0x17   : > { %p2462_p8 = pneg %p2446_p6 }
  0x1a   : > { %s2103_s23 = scalar_lea.hbm %s2835_s2, 512 }
  0x1b   : > { %p2104_p7 = scmp.ne.s32.totalorder %s2835_s2, %s2103_s23  ;;  %p2110_p11 = scmp.lt.u32.totalorder %s2103_s23, %s2835_s2 }
  0x1d   : > { %p2106_p9 = pnand %p2462_p8, %p2104_p7 }
  0x1f   : > { %p2107_p10 = pneg %p2106_p9 }
  0x21   : > { %p2112_p12 = pnand %p2110_p11, %p2107_p10 }
  0x23   : > { %2115 = shalt.err (!%p2112_p12)
}
  0x24   : > { %s2116_s19 = scalar_lea.vmem %s2439_s15, 512  ;;  %p2124_p4 = scmp.lt.s32.totalorder %s2439_s15, %s2439_s15 }
  0x25   : > { %p2117_p13 = scmp.ne.s32.totalorder %s2439_s15, %s2116_s19  ;;  %p2125_p5 = scmp.lt.s32.totalorder %s2116_s19, %s2116_s19 }
  0x27   : > { %p2119_p0 = pnand %p2117_p13, %p2462_p8  ;;  %p2126_p7 = por %p2125_p5, %p2124_p4 }
  0x29   : > { %p2120_p2 = pneg %p2119_p0 }
  0x2b   : > { %p2127_p9 = pnand %p2126_p7, %p2120_p2 }
  0x2d   : > { %2130 = shalt.err (!%p2127_p9)
}
  0x2e   : > { %s2340_s21 = smov 128   ;;  %s2341_s22 = smov 8  }
  0x2f   : > { %1999 = dma.hbm_to_vmem [thread:$0]  (!%p2446_p6), %s2835_s2, 512, %s2439_s15, [#allocation7], %s2340_s21, %s2340_s21, %s2341_s22  }
  0x30   : > { %s2131_s17 = scalar_lea.hbm %s2818_s4, 512 }
  0x31   : > { %p2132_p5 = scmp.ne.s32.totalorder %s2818_s4, %s2131_s17  ;;  %p2138_p12 = scmp.lt.u32.totalorder %s2131_s17, %s2818_s4 }
  0x33   : > { %p2134_p10 = pnand %p2132_p5, %p2462_p8 }
  0x35   : > { %p2135_p11 = pneg %p2134_p10 }
  0x37   : > { %p2140_p13 = pnand %p2138_p12, %p2135_p11 }
  0x39   : > { %2143 = shalt.err (!%p2140_p13)
}
  0x3a   : > { %s2144_s15 = scalar_lea.vmem %s2450_s18, 512  ;;  %p2152_p7 = scmp.lt.s32.totalorder %s2450_s18, %s2450_s18 }
  0x3b   : > { %p2145_p0 = scmp.ne.s32.totalorder %s2450_s18, %s2144_s15  ;;  %p2153_p9 = scmp.lt.s32.totalorder %s2144_s15, %s2144_s15 }
  0x3d   : > { %p2147_p2 = pnand %p2145_p0, %p2462_p8  ;;  %p2154_p5 = por %p2153_p9, %p2152_p7 }
  0x3f   : > { %p2148_p4 = pneg %p2147_p2 }
  0x41   : > { %p2155_p10 = pnand %p2154_p5, %p2148_p4 }
  0x43   : > { %2158 = shalt.err (!%p2155_p10)
}
  0x44   : > { %2005 = dma.hbm_to_vmem [thread:$0]  (!%p2446_p6), %s2818_s4, 512, %s2450_s18, [#allocation10], %s2340_s21, %s2340_s21, %s2341_s22  }
  0x45   : > { %s2159_s24 = scalar_lea.hbm %s2817_s3, 512 }
  0x46   : > { %p2160_p11 = scmp.ne.s32.totalorder %s2817_s3, %s2159_s24  ;;  %p2166_p0 = scmp.lt.u32.totalorder %s2159_s24, %s2817_s3 }
  0x48   : > { %p2162_p12 = pnand %p2160_p11, %p2462_p8 }
  0x4a   : > { %p2163_p13 = pneg %p2162_p12 }
  0x4c   : > { %p2168_p2 = pnand %p2166_p0, %p2163_p13 }
  0x4e   : > { %2171 = shalt.err (!%p2168_p2)
}
  0x4f   : > { %s2172_s15 = scalar_lea.vmem %s271_s20, 512  ;;  %p2180_p5 = scmp.lt.s32.totalorder %s271_s20, %s271_s20 }
  0x50   : > { %p2173_p4 = scmp.ne.s32.totalorder %s271_s20, %s2172_s15  ;;  %p2181_p10 = scmp.lt.s32.totalorder %s2172_s15, %s2172_s15 }
  0x52   : > { %p2175_p7 = pnand %p2173_p4, %p2462_p8  ;;  %p2182_p3 = por %p2181_p10, %p2180_p5 }
  0x54   : > { %p2176_p9 = pneg %p2175_p7 }
  0x56   : > { %p2183_p1 = pnand %p2182_p3, %p2176_p9 }
  0x58   : > { %2186 = shalt.err (!%p2183_p1)
}
  0x59   : > { %2002 = dma.hbm_to_vmem [thread:$0]  (!%p2446_p6), %s2817_s3, 512, %s271_s20, [#allocation7], %s2340_s21, %s2340_s21, %s2341_s22  }
  0x5a   : > { %s2342_s8 = smov [#allocation11]   ;;  %s2187_s25 = scalar_lea.hbm %s2820_s6, 512 }
  0x5b   : > { %s299_s11 = sshll.u32 %s2342_s8, 4  ;;  %p2188_p1 = scmp.ne.s32.totalorder %s2820_s6, %s2187_s25  ;;  %s300_s11 = int_to_ptr.vmem [resolvable:$true] %s299_s11 }
  0x5c   : > { %p2194_p12 = scmp.lt.u32.totalorder %s2187_s25, %s2820_s6 }
  0x5d   : > { %p2190_p3 = pnand %p2188_p1, %p2462_p8 }
  0x5f   : > { %p2191_p11 = pneg %p2190_p3 }
  0x61   : > { %p2196_p13 = pnand %p2194_p12, %p2191_p11 }
  0x63   : > { %2199 = shalt.err (!%p2196_p13)
}
  0x64   : > { %s2200_s20 = scalar_lea.vmem %s300_s11, 512  ;;  %p2208_p7 = scmp.lt.s32.totalorder %s300_s11, %s300_s11 }
  0x65   : > { %p2201_p0 = scmp.ne.s32.totalorder %s300_s11, %s2200_s20  ;;  %p2209_p9 = scmp.lt.s32.totalorder %s2200_s20, %s2200_s20 }
  0x67   : > { %p2203_p2 = pnand %p2201_p0, %p2462_p8  ;;  %p2210_p5 = por %p2209_p9, %p2208_p7 }
  0x69   : > { %p2204_p4 = pneg %p2203_p2 }
  0x6b   : > { %p2211_p10 = pnand %p2210_p5, %p2204_p4 }
  0x6d   : > { %2214 = shalt.err (!%p2211_p10)
}
  0x6e   : > { %2008 = dma.hbm_to_vmem [thread:$0]  (!%p2446_p6), %s2820_s6, 512, %s300_s11, [#allocation10], %s2340_s21, %s2340_s21, %s2341_s22  }
  0x6f   : > { %s1783_s16 = sadd.s32 4294967294, %s2335_s10   ;;  %s38_s26 = sadd.s32 1, %s2331_s9 }
  0x70   : > { %p40_p8 = scmp.ge.s32.totalorder %s38_s26, 2  ;;  %s45_s8 = sadd.s32 1, %s2323_s29 }
  0x71   : > { %p52_p1 = scmp.ne.s32.totalorder %s2323_s29, %s2319_s28  ;;  %p53_p3 = scmp.eq.s32.totalorder %s2335_s10, 0 }
  0x72   : > { %s2857_s26 = smov (%p40_p8, %s38_s26), 0  ;;  %p58_p12 = scmp.ne.s32.totalorder %s2319_s28, %s2315_s27 }
  0x73   : > { %p2563_p11 = por %p53_p3, %p52_p1  ;;  %s42_s21 = ssub.s32 %s2331_s9, %s2857_s26 }
  0x74   : > { %s2838_s22 = sadd.s32 4294967295, %s2335_s10   ;;  %p43_p13 = scmp.eq.s32.totalorder %s42_s21, 0 }
  0x75   : > { %p229_p6 = scmp.eq.s32.totalorder %s2838_s22, 1  ;;  %p2839_p0 = scmp.ne.s32.totalorder %s2832_s12, 0 }
  0x76   : > { %p235_p7 = scmp.eq.s32.totalorder %s1783_s16, 1  ;;  %p2021_p5 = scmp.lt.s32.totalorder %s2335_s10, 2 }
  0x77   : > { %p2575_p2 = por %p2839_p0, %p58_p12  ;;  %p2579_p4 = por %p229_p6, %p52_p1 }
  0x78   : > { %s2584_s25 = scalar_select %p43_p13, %s2323_s29, %s45_s8  }
  0x79   : > { %s2841_s24 = scalar_select %p2579_p4, 1, 0 }
  0x7a   : > { %p2586_p9 = por %p235_p7, %p58_p12  ;;  %s316_s17 = sand.u32 1, %s2323_s29  }
  0x7b   : > { %s1791_s19 = sshll.u32 %s2331_s9, 7  ;;  %s1790_s15 = sshll.u32 %s316_s17, 3 }
  0x7c   : > { %s2842_s14 = scalar_select %p2586_p9, 1, 0 }
  0x7d   : > { %s2596_s7 = scalar_lea.hbm %s2814_s0, %s1791_s19  ;;  %s320_s16 = scalar_lea.vmem [#allocation3], %s1790_s15 }
  0x7e   : > { %s327_s8 = sshll.u32 %s320_s16, 4  ;;  %p2600_p10 = pnand %p2021_p5, %p2563_p11  ;;  %s2604_s8 = int_to_ptr.vmem [resolvable:$true] %s327_s8 }
  0x7f   : > { %s317_s22 = scalar_lea.sflag [#allocation4], %s316_s17  ;;  %s2215_s2 = scalar_lea.hbm %s2596_s7, 128 }
  0x80   : > { %p2216_p8 = scmp.ne.s32.totalorder %s2596_s7, %s2215_s2  ;;  %p2217_p1 = pneg %p2600_p10 }
  0x81   : > { %s2220_s23 = scalar_lea.hbm %s2814_s0, 256  ;;  %p2221_p11 = scmp.lt.u32.totalorder %s2596_s7, %s2814_s0 }
  0x82   : > { %p2218_p3 = pnand %p2217_p1, %p2216_p8  ;;  %p2222_p6 = scmp.lt.u32.totalorder %s2220_s23, %s2215_s2 }
  0x83   : > { %p2224_p0 = scmp.lt.u32.totalorder %s2215_s2, %s2596_s7 }
  0x84   : > { %p2219_p12 = pneg %p2218_p3  ;;  %p2223_p13 = por %p2222_p6, %p2221_p11 }
  0x86   : > { %p2225_p7 = por %p2224_p0, %p2223_p13 }
  0x88   : > { %p2226_p5 = pnand %p2225_p7, %p2219_p12 }
  0x8a   : > { %2229 = shalt.err (!%p2226_p5)
}
  0x8b   : > { %s2230_s17 = scalar_lea.vmem %s2604_s8, 128  ;;  %s2343_s16 = smov [#allocation3]  }
  0x8c   : > { %p2231_p8 = scmp.ne.s32.totalorder %s2604_s8, %s2230_s17  ;;  %s2235_s19 = sshll.u32 %s2343_s16, 4  ;;  %s2236_s19 = int_to_ptr.vmem [resolvable:$false] %s2235_s19 }
  0x8d   : > { %s2237_s15 = scalar_lea.vmem %s2236_s19, 256  ;;  %p2238_p4 = scmp.lt.s32.totalorder %s2604_s8, %s2236_s19 }
  0x8e   : > { %p2233_p3 = pnand %p2231_p8, %p2217_p1  ;;  %p2239_p11 = scmp.lt.s32.totalorder %s2237_s15, %s2230_s17 }
  0x90   : > { %p2234_p9 = pneg %p2233_p3  ;;  %p2240_p6 = por %p2239_p11, %p2238_p4 }
  0x92   : > { %p2241_p13 = pnand %p2240_p6, %p2234_p9 }
  0x94   : > { %2244 = shalt.err (!%p2241_p13)
}
  0x95   : > { %2012 = dma.hbm_to_vmem [thread:$0]  (!%p2600_p10), %s2596_s7, 128, %s2604_s8, %s317_s22  }
  0x96   : > { %p2844_p12 = scmp.ne.s32.totalorder %s2833_s13, 0 }
  0x97   : > { %s2634_s2 = sand.u32 (!%p2844_p12), 1, %s2319_s28  }
  0x98   : > { %336 = sbr.rel (%p2844_p12) target bundleno = 2763 (0xacb), region = 52  ;;  %s1793_s23 = sshll.u32 (!%p2844_p12), %s2634_s2, 3 }
  0x99   : > { %s339_s20 = scalar_lea.sflag (!%p2844_p12), [#allocation4], %s2634_s2  ;;  %s2640_s18 = scalar_lea.vmem (!%p2844_p12), [#allocation3], %s1793_s23 }
  0x9f   : > { %2298 = dma.done.wait (%p2575_p2), %s339_s20, 128  }
  0xa0   : > { %2300 = vsyncadd (%p2575_p2), %s339_s20, 4294967168  ;;  %p2845_p4 = scmp.ne.s32.totalorder %s2832_s12, 0 }
  0xa2   : > { %2302 = dma.done.wait (%p2845_p4), [#allocation7], 1024  }
  0xa3   : > { %2304 = vsyncadd (%p2845_p4), [#allocation7], 4294966272 }
  0xa4   : > { %2306 = dma.done.wait (%p2845_p4), [#allocation10], 1024  }
  0xa5   : > { %2308 = vsyncadd (%p2845_p4), [#allocation10], 4294966272  ;;  %v2344_v0 = vmov 0.0|0.0   ;;  %vm2345_vm0 = vmmov 0   ;;  %v2346_v1 = vmov 0.0   ;;  %v399_v2 = vld [vmem:[#allocation8] sm:$0xff]  ;;  %v411_v21 = vlaneseq }
  0xa6   : > { %1964 = vmatprep.subr.bf16.mxu1 %v2344_v0  ;;  %1958 = vmatprep.subr.bf16.mxu0 %v2344_v0  ;;  %v400_v3 = vld [vmem:[#allocation8 + $0x8] sm:$0xff]  ;;  %v394_v4 = vld [vmem:[#allocation6] sm:$0xff]  ;;  %v401_v7 = vld [vmem:[#allocation8 + $0x10] sm:$0xff]  ;;  %vm415_vm1 = vcmask 261120   ;;  %vm639_vm2 = vcmask 64512   ;;  %s2347_s11 = smov 120  }
  0xa7   : > { %1884 = vmatprep.mubr.msk.f32.mxu1 %vm2345_vm0, %v2346_v1  ;;  %1873 = vmatprep.mubr.msk.f32.mxu0 %vm2345_vm0, %v2346_v1  ;;  %v1965_v5 = vpack.c.bf16 %v400_v3, %v399_v2  ;;  %v395_v6 = vld [vmem:[#allocation6 + $0x8] sm:$0xff]  ;;  %v402_v8 = vld [vmem:[#allocation8 + $0x18] sm:$0xff]  ;;  %v396_v10 = vld [vmem:[#allocation6 + $0x10] sm:$0xff]  ;;  %v412_v22 = vshrl.u32 %v411_v21, 7  ;;  %s2348_s21 = smov 112   ;;  %s2349_s22 = smov 104  }
  0xa8   : > { %v1959_v9 = vpack.c.bf16 %v395_v6, %v394_v4  ;;  %v397_v11 = vld [vmem:[#allocation6 + $0x18] sm:$0xff]  ;;  %v1968_v12 = vpack.c.bf16 %v402_v8, %v401_v7  ;;  %v404_v15 = vld [vmem:[#allocation9] sm:$0xff]  ;;  %v405_v16 = vld [vmem:[#allocation9 + $0x8] sm:$0xff]  ;;  %s2846_s19 = sld [smem:[#allocation18_spill]]  ;;  %s1823_s15 = sshll.u32 %s2327_s30, 7 }
  0xa9   : > { %1966 = vmatpush3.bf16.msra.mxu1 %v1965_v5  ;;  %v1962_v13 = vpack.c.bf16 %v397_v11, %v396_v10  ;;  %v391_v14 = vld [vmem:[%s2640_s18] sm:$0xff]  ;;  %v1971_v18 = vpack.c.bf16 %v405_v16, %v404_v15  ;;  %v492_v23 = vsub.s32 1, %v412_v22  ;;  %v410_v24 = vld [vmem:[%s2819_s5] sm:$0x7]  ;;  %v413_v25 = vsub.s32 0, %v412_v22  ;;  %v802_v6 = vld [vmem:[#allocation11] sm:$0xff] }
  0xaa   : > { %1960 = vmatpush3.bf16.msra.mxu0 %v1959_v9  ;;  %1967 = vmatprep.subr.bf16.mxu1 %v2344_v0  ;;  %v406_v17 = vld [vmem:[#allocation9 + $0x10] sm:$0xff]  ;;  %v407_v19 = vld [vmem:[#allocation9 + $0x18] sm:$0xff]  ;;  %v566_v35 = vsub.s32 2, %v412_v22  ;;  %v2696_v42 = vld [vmem:[%s2815_s1] sm:$0xff]  ;;  %s390_s20 = scalar_lea.vmem [#allocation12], %s1793_s23  ;;  %s1631_s8 = scalar_lea.sflag [#allocation5], %s2634_s2 }
  0xab   : > { %1961 = vmatprep.subr.bf16.mxu0 %v2344_v0  ;;  %v1974_v20 = vpack.c.bf16 %v407_v19, %v406_v17  ;;  %v493_v26 = vrot.slane %v410_v24, %v492_v23  ;;  %v414_v27 = vrot.slane %v410_v24, %v413_v25  ;;  %s1644_s18 = sshll.u32 %s390_s20, 4  ;;  %p2848_p9 = scmp.ne.s32.totalorder %s2841_s24, 0  ;;  %s2766_s18 = int_to_ptr.vmem [resolvable:$true] %s1644_s18 }
  0xac   : > { %v567_v36 = vrot.slane %v410_v24, %v566_v35  ;;  %s2350_s30 = smov [#allocation12]  }
  0xad   : > { %1969 = vmatpush3.bf16.msra.mxu1 %v1968_v12  ;;  %s2249_s23 = sshll.u32 %s2350_s30, 4  ;;  %s2250_s23 = int_to_ptr.vmem [resolvable:$false] %s2249_s23 }
  0xae   : > { %1963 = vmatpush3.bf16.msra.mxu0 %v1962_v13  ;;  %1898 = vmatprep.subr.mxu1 %v2346_v1  ;;  %p2252_p0 = scmp.lt.s32.totalorder %s2766_s18, %s2250_s23 }
  0xaf   : > { %1970 = vmatprep.subr.bf16.mxu0 %v2344_v0 }
  0xb0   : > { %1885 = vmatmul.mubr.msk.f32.vlgmr.msra.gmra.mrb[0].mxu1 %vm415_vm1, %v391_v14 }
  0xb1   : > { %1874 = vmatmul.mubr.msk.f32.vlgmr.msra.gmra.mrb[0].mxu0 %vm415_vm1, %v391_v14  ;;  %1900 = vmatprep.mubr.msk.f32.mxu1 %vm2345_vm0, %v2346_v1 }
  0xb2   : > { %1895 = vmatprep.mubr.msk.f32.mxu0 %vm2345_vm0, %v2346_v1  ;;  %1972 = vmatpush3.bf16.msra.mxu0 %v1971_v18 }
  0xb3   : > { %1973 = vmatprep.subr.bf16.mxu0 %v2344_v0  ;;  %v1808_v0 = vld [vmem:[#allocation11 + $0x8] sm:$0xff] }
  0xb6   : > { %1975 = vmatpush3.bf16.msra.mxu0 %v1974_v20 }
  0xb7   : > { %1908 = vmatprep.subr.mxu0 %v2346_v1 }
  0xb9   : > { %1896 = vmatmul.mubr.msk.f32.vlgmr.msra.gmra.mrb[2].mxu0 %vm415_vm1, %v391_v14 }
  0xba   : > { %1910 = vmatprep.mubr.msk.f32.mxu0 %vm2345_vm0, %v2346_v1 }
 0x183   : > { %v560_v28 = vpop.f32.mrb[0].mxu1 }
 0x184   : > { %v561_v29 = vadd.f32 %v560_v28, %v493_v26  ;;  %v485_v30 = vpop.f32.mrb[0].mxu0  ;;  %v1886_v31 = vpop.f32.mrb[1].mxu1 }
 0x185   : > { %v486_v32 = vadd.f32 %v485_v30, %v414_v27  ;;  %v1875_v33 = vpop.f32.mrb[1].mxu0 }
 0x186   : > { %805 = vrot.lane.b32.xlu0 %v561_v29, %s2347_s11  ;;  %1899 = vmatpush3.xpose.msk.msra.mxu1 %vm639_vm2, %v561_v29  ;;  %v1814_v33 = vld [vmem:[#allocation11 + $0x10] sm:$0xff] }
 0x187   : > { %v2675_v34 = vmul.f32 0.35355338, %v486_v32  ;;  %1903 = vmatprep.subr.mxu1 %v2346_v1 }
 0x189   : > { %1901 = vmatmul.mubr.msk.f32.vlgmr.msra.gmra.mrb[2].mxu1 %vm639_vm2, %v2675_v34 }
 0x18a   : > { %803 = vrot.lane.b32.xlu0 %v2675_v34, %s2347_s11  ;;  %1905 = vmatprep.mubr.msk.f32.mxu1 %vm2345_vm0, %v2346_v1 }
 0x18c   : > { %v634_v37 = vpop.f32.mrb[2].mxu0 }
 0x18d   : > { %v2684_v38 = vadd.f32 %v634_v37, %v567_v36  ;;  %v1897_v39 = vpop.f32.mrb[3].mxu0 }
 0x18f   : > { %1904 = vmatpush3.msra.mxu1 %v2684_v38 }
 0x190   : > { %1913 = vmatprep.subr.mxu1 %v2346_v1 }
 0x1f8   : > { %v806_v40 = vpop.permute.xlu0 %805 }
 0x1f9   : > { %1909 = vmatpush3.xpose.msk.msra.mxu0 %vm639_vm2, %v806_v40 }
 0x1fa   : > { %1918 = vmatprep.subr.mxu0 %v2346_v1 }
 0x1fc   : > { %v804_v41 = vpop.permute.xlu0 %803 }
 0x1fd   : > { %1911 = vmatmul.mubr.msk.f32.vlgmr.msra.gmra.mrb[4].mxu0 %vm639_vm2, %v804_v41 }
 0x1fe   : > { %1920 = vmatprep.mubr.msk.f32.mxu0 %vm2345_vm0, %v2346_v1  ;;  %1919 = vmatpush3.msra.mxu0 %v1808_v0 }
 0x1ff   : > { %1928 = vmatprep.subr.mxu0 %v2346_v1 }
 0x25c   : > { %v712_v43 = vpop.f32.mrb[2].mxu1 }
 0x25d   : > { %v713_v44 = vadd.f32 %v712_v43, %v2696_v42  ;;  %v1902_v45 = vpop.f32.mrb[3].mxu1 }
 0x25f   : > { %v716_v46 = vsel %vm639_vm2, %v713_v44, -inf }
 0x260   : > { %717 = vmax.xlane.f32.xlu1 %v716_v46 }
 0x2d0   : > { %v877_v47 = vpop.f32.mrb[4].mxu0 }
 0x2d1   : > { %v878_v48 = vadd.f32 %v877_v47, %v2696_v42  ;;  %v1912_v49 = vpop.f32.mrb[5].mxu0  ;;  %v1819_v47 = vld [vmem:[#allocation11 + $0x18] sm:$0xff] }
 0x2d3   : > { %v881_v50 = vsel %vm639_vm2, %v878_v48, -inf }
 0x2d4   : > { %882 = vmax.xlane.f32.xlu1 %v881_v50 }
 0x2ed   : > { %v718_v51 = vpop.xlane.xlu1 %717 }
 0x2ee   : > { %v719_v52 = vsub.f32 %v713_v44, %v718_v51 }
 0x2f0   : > { %v720_v53 = vmul.f32 1.442695, %v719_v52 }
 0x2f2   : > { %2087 = vpow2.f32 %v720_v53 }
 0x2fc   : > { %v2088_v54 = vpop.eup %2087 }
 0x2fd   : > { %v722_v55 = vsel %vm639_vm2, %v2088_v54, 0.0 }
 0x2fe   : > { %723 = vadd.xlane.f32.xlu0 %v722_v55  ;;  %v1821_v55 = vld [vmem:[%s2846_s19] ss:$0 sm:$0xff] }
 0x314   : > { %1208 = vrot.lane.b32.xlu0 %v2684_v38, %s2348_s21 }
 0x318   : > { %1364 = vrot.lane.b32.xlu0 %v561_v29, %s2349_s22 }
 0x361   : > { %v883_v56 = vpop.xlane.xlu1 %882 }
 0x362   : > { %v884_v57 = vsub.f32 %v878_v48, %v883_v56 }
 0x364   : > { %v885_v58 = vmul.f32 1.442695, %v884_v57 }
 0x366   : > { %2089 = vpow2.f32 %v885_v58 }
 0x370   : > { %v2090_v59 = vpop.eup %2089 }
 0x371   : > { %v887_v60 = vsel %vm639_vm2, %v2090_v59, 0.0 }
 0x372   : > { %888 = vadd.xlane.f32.xlu1 %v887_v60 }
 0x383   : > { %893 = vrot.lane.b32.xlu1 %v2684_v38, %s2347_s11  ;;  %s2847_s11 = sld [smem:[#allocation19_spill]] }
 0x387   : > { %1121 = vrot.lane.b32.xlu1 %v561_v29, %s2348_s21 }
 0x389   : > { %s2764_s7 = scalar_lea.hbm %s2847_s11, %s1823_s15 }
 0x38b   : > { %v724_v61 = vpop.xlane.xlu0 %723  ;;  %1119 = vrot.lane.b32.xlu1 %v2675_v34, %s2348_s21  ;;  %s2245_s21 = scalar_lea.vmem %s2766_s18, 128 }
 0x38c   : > { %2091 = vrcp.f32 %v724_v61  ;;  %p2246_p2 = scmp.ne.s32.totalorder %s2766_s18, %s2245_s21 }
 0x38e   : > { %p2247_p10 = pnand %p2246_p2, %p2848_p9 }
 0x38f   : > { %v1209_v8 = vpop.permute.xlu0 %1208 }
 0x390   : > { %p2248_p1 = pneg %p2247_p10 }
 0x393   : > { %v1365_v28 = vpop.permute.xlu0 %1364 }
 0x396   : > { %v2092_v62 = vpop.eup %2091 }
 0x397   : > { %v726_v63 = vmul.f32 %v2092_v62, %v2088_v54 }
 0x399   : > { %1906 = vmatmul.mubr.msk.f32.vlgmr.msra.gmra.mrb[4].mxu1 %vm639_vm2, %v726_v63 }
 0x39a   : > { %1915 = vmatprep.mubr.msk.f32.mxu1 %vm2345_vm0, %v2346_v1 }
 0x3ff   : > { %v889_v2 = vpop.xlane.xlu1 %888 }
 0x400   : > { %2093 = vrcp.f32 %v889_v2 }
 0x403   : > { %v894_v3 = vpop.permute.xlu1 %893 }
 0x404   : > { %1914 = vmatpush3.msra.mxu1 %v894_v3 }
 0x405   : > { %1923 = vmatprep.subr.mxu1 %v2346_v1 }
 0x407   : > { %v1122_v10 = vpop.permute.xlu1 %1121 }
 0x40a   : > { %v2094_v4 = vpop.eup %2093 }
 0x40b   : > { %v891_v5 = vmul.f32 %v2094_v4, %v2090_v59  ;;  %v1120_v13 = vpop.permute.xlu1 %1119 }
 0x40d   : > { %1916 = vmatmul.mubr.msk.f32.vlgmr.msra.gmra.mrb[6].mxu1 %vm639_vm2, %v891_v5 }
 0x40e   : > { %1924 = vmatpush3.msra.mxu1 %v802_v6  ;;  %1925 = vmatprep.mubr.msk.f32.mxu1 %vm2345_vm0, %v2346_v1 }
 0x40f   : > { %1933 = vmatprep.subr.mxu1 %v2346_v1 }
 0x46c   : > { %v796_v7 = vpop.f32.mrb[4].mxu1 }
 0x46d   : > { %v1907_v9 = vpop.f32.mrb[5].mxu1  ;;  %1926 = vmatmul.mubr.msk.f32.vlgmr.msra.gmra.mrb[8].mxu1 %vm639_vm2, %v796_v7 }
 0x46e   : > { %1934 = vmatpush3.msra.mxu1 %v1209_v8  ;;  %1935 = vmatprep.mubr.msk.f32.mxu1 %vm2345_vm0, %v2346_v1 }
 0x46f   : > { %1943 = vmatprep.subr.mxu1 %v2346_v1 }
 0x4e0   : > { %v965_v11 = vpop.f32.mrb[6].mxu1 }
 0x4e1   : > { %v1917_v12 = vpop.f32.mrb[7].mxu1  ;;  %1921 = vmatmul.mubr.msk.f32.vlgmr.msra.gmra.mrb[6].mxu0 %vm639_vm2, %v965_v11 }
 0x4e2   : > { %1929 = vmatpush3.xpose.msk.msra.mxu0 %vm639_vm2, %v1122_v10  ;;  %1930 = vmatprep.mubr.msk.f32.mxu0 %vm2345_vm0, %v2346_v1 }
 0x4e3   : > { %1938 = vmatprep.subr.mxu0 %v2346_v1 }
 0x4e5   : > { %1931 = vmatmul.mubr.msk.f32.vlgmr.msra.gmra.mrb[8].mxu0 %vm639_vm2, %v1120_v13 }
 0x4e6   : > { %1940 = vmatprep.mubr.msk.f32.mxu0 %vm2345_vm0, %v2346_v1  ;;  %1939 = vmatpush3.msra.mxu0 %v1814_v33 }
 0x4e7   : > { %1948 = vmatprep.subr.mxu0 %v2346_v1 }
 0x540   : > { %v1115_v14 = vpop.f32.mrb[8].mxu1 }
 0x541   : > { %v1927_v15 = vpop.f32.mrb[9].mxu1 }
 0x5b4   : > { %v1042_v16 = vpop.f32.mrb[6].mxu0 }
 0x5b5   : > { %v1116_v17 = vadd.f32 %v1115_v14, %v1042_v16  ;;  %v1922_v18 = vpop.f32.mrb[7].mxu0 }
 0x5b8   : > { %v1193_v19 = vpop.f32.mrb[8].mxu0 }
 0x5b9   : > { %v1194_v20 = vadd.f32 %v1193_v19, %v2696_v42  ;;  %v1932_v21 = vpop.f32.mrb[9].mxu0 }
 0x5bb   : > { %v1197_v22 = vsel %vm639_vm2, %v1194_v20, -inf }
 0x5bc   : > { %1198 = vmax.xlane.f32.xlu1 %v1197_v22 }
 0x649   : > { %v1199_v23 = vpop.xlane.xlu1 %1198 }
 0x64a   : > { %v1200_v24 = vsub.f32 %v1194_v20, %v1199_v23 }
 0x64c   : > { %v1201_v25 = vmul.f32 1.442695, %v1200_v24 }
 0x64e   : > { %2095 = vpow2.f32 %v1201_v25 }
 0x658   : > { %v2096_v26 = vpop.eup %2095 }
 0x659   : > { %v1203_v27 = vsel %vm639_vm2, %v2096_v26, 0.0 }
 0x65a   : > { %1204 = vadd.xlane.f32.xlu0 %v1203_v27 }
 0x670   : > { %1362 = vrot.lane.b32.xlu0 %v2675_v34, %s2349_s22 }
 0x6e7   : > { %v1205_v29 = vpop.xlane.xlu0 %1204 }
 0x6e8   : > { %2097 = vrcp.f32 %v1205_v29 }
 0x6eb   : > { %v1363_v32 = vpop.permute.xlu0 %1362 }
 0x6f2   : > { %v2098_v30 = vpop.eup %2097 }
 0x6f3   : > { %v1207_v31 = vmul.f32 %v2098_v30, %v2096_v26 }
 0x6f5   : > { %1936 = vmatmul.mubr.msk.f32.vlgmr.msra.gmra.mrb[10].mxu1 %vm639_vm2, %v1207_v31 }
 0x6f6   : > { %1944 = vmatpush3.xpose.msk.msra.mxu1 %vm639_vm2, %v1365_v28  ;;  %1945 = vmatprep.mubr.msk.f32.mxu1 %vm2345_vm0, %v2346_v1 }
 0x6f7   : > { %1953 = vmatprep.subr.mxu1 %v2346_v1 }
 0x6f9   : > { %1946 = vmatmul.mubr.msk.f32.vlgmr.msra.gmra.mrb[12].mxu1 %vm639_vm2, %v1363_v32 }
 0x6fa   : > { %1955 = vmatprep.mubr.msk.f32.mxu1 %vm2345_vm0, %v2346_v1  ;;  %1954 = vmatpush3.msra.mxu1 %v1819_v47 }
 0x7c8   : > { %v1280_v34 = vpop.f32.mrb[10].mxu1 }
 0x7c9   : > { %v1937_v35 = vpop.f32.mrb[11].mxu1  ;;  %1941 = vmatmul.mubr.msk.f32.vlgmr.msra.gmra.mrb[10].mxu0 %vm639_vm2, %v1280_v34 }
 0x7ca   : > { %1950 = vmatprep.mubr.msk.f32.mxu0 %vm2345_vm0, %v2346_v1 }
 0x7cc   : > { %v1436_v36 = vpop.f32.mrb[12].mxu1 }
 0x7cd   : > { %v1437_v37 = vadd.f32 %v1436_v36, %v2696_v42  ;;  %v1947_v39 = vpop.f32.mrb[13].mxu1 }
 0x7cf   : > { %v1440_v40 = vsel %vm639_vm2, %v1437_v37, -inf }
 0x7d0   : > { %1441 = vmax.xlane.f32.xlu0 %v1440_v40 }
 0x85d   : > { %v1442_v41 = vpop.xlane.xlu0 %1441 }
 0x85e   : > { %v1443_v43 = vsub.f32 %v1437_v37, %v1442_v41 }
 0x860   : > { %v1444_v44 = vmul.f32 1.442695, %v1443_v43 }
 0x862   : > { %2099 = vpow2.f32 %v1444_v44 }
 0x86c   : > { %v2100_v45 = vpop.eup %2099 }
 0x86d   : > { %v1446_v46 = vsel %vm639_vm2, %v2100_v45, 0.0 }
 0x86e   : > { %1447 = vadd.xlane.f32.xlu1 %v1446_v46 }
 0x87f   : > { %1451 = vrot.lane.b32.xlu1 %v2684_v38, %s2349_s22  ;;  %s2251_s22 = scalar_lea.vmem %s2250_s23, 256 }
 0x880   : > { %p2253_p7 = scmp.lt.s32.totalorder %s2251_s22, %s2245_s21 }
 0x882   : > { %p2254_p5 = por %p2253_p7, %p2252_p0 }
 0x884   : > { %p2255_p8 = pnand %p2254_p5, %p2248_p1 }
 0x89c   : > { %v1357_v1 = vpop.f32.mrb[10].mxu0 }
 0x89d   : > { %v1361_v48 = vadd.f32 %v1357_v1, %v1116_v17  ;;  %v1942_v42 = vpop.f32.mrb[11].mxu0 }
 0x8fb   : > { %v1448_v49 = vpop.xlane.xlu1 %1447 }
 0x8fc   : > { %2101 = vrcp.f32 %v1448_v49 }
 0x8ff   : > { %v1452_v50 = vpop.permute.xlu1 %1451 }
 0x900   : > { %1949 = vmatpush3.msra.mxu0 %v1452_v50 }
 0x906   : > { %v2102_v51 = vpop.eup %2101 }
 0x907   : > { %v1450_v52 = vmul.f32 %v2102_v51, %v2100_v45 }
 0x909   : > { %1951 = vmatmul.mubr.msk.f32.vlgmr.msra.gmra.mrb[12].mxu0 %vm639_vm2, %v1450_v52 }
 0x9dc   : > { %v1523_v53 = vpop.f32.mrb[12].mxu0 }
 0x9dd   : > { %v1952_v54 = vpop.f32.mrb[13].mxu0  ;;  %1956 = vmatmul.mubr.msk.f32.vlgmr.msra.gmra.mrb[14].mxu1 %vm639_vm2, %v1523_v53 }
 0xab0   : > { %v1600_v38 = vpop.f32.mrb[14].mxu1 }
 0xab1   : > { %v1604_v56 = vadd.f32 %v1600_v38, %v1361_v48  ;;  %v1957_v57 = vpop.f32.mrb[15].mxu1 }
 0xab3   : > { %v1616_v58 = vadd.f32 %v1821_v55, %v1604_v56 }
 0xab5   : > { %1617 = vst.msk [vmem:[#allocation2] sm:$0xff] %vm415_vm1, %v1616_v58 }
 0xabc   : > { %v1628_v59 = vld [vmem:[#allocation2] sm:$0xff] }
 0xabd   : > { %1629 = vst.msk [vmem:[%s390_s20] sm:$0xff] %vm415_vm1, %v1628_v59 }
 0xabe   : > { %2258 = shalt.err (!%p2255_p8)
}
 0xabf   : > { %s2259_s2 = scalar_lea.hbm %s2764_s7, 128  ;;  %s2263_s19 = scalar_lea.hbm %s2847_s11, 256 }
 0xac0   : > { %p2260_p3 = scmp.ne.s32.totalorder %s2764_s7, %s2259_s2  ;;  %p2264_p13 = scmp.lt.u32.totalorder %s2764_s7, %s2847_s11 }
 0xac1   : > { %p2265_p12 = scmp.lt.u32.totalorder %s2263_s19, %s2259_s2  ;;  %p2267_p2 = scmp.lt.u32.totalorder %s2259_s2, %s2764_s7 }
 0xac2   : > { %p2261_p11 = pnand %p2260_p3, %p2848_p9 }
 0xac3   : > { %p2266_p4 = por %p2265_p12, %p2264_p13 }
 0xac4   : > { %p2262_p6 = pneg %p2261_p11 }
 0xac5   : > { %p2268_p10 = por %p2267_p2, %p2266_p4 }
 0xac7   : > { %p2269_p1 = pnand %p2268_p10, %p2262_p6 }
 0xac9   : > { %2272 = shalt.err (!%p2269_p1)
}
 0xaca   : > { %1994 = dma.vmem_to_hbm [thread:$0]  (%p2848_p9), %s2766_s18, 128, %s2764_s7, %s1631_s8  }
 0xacb PF: > { %s1656_s12 = sand.u32 1, %s2315_s27   ;;  %p2849_p0 = scmp.ne.s32.totalorder %s2842_s14, 0 }
 0xacc   : > { %p2850_p7 = scmp.ge.s32.totalorder %s2335_s10, 2  ;;  %s1657_s13 = scalar_lea.sflag [#allocation5], %s1656_s12 }
 0xace   : > { %p2014_p5 = pnand %p2850_p7, %p2849_p0 }
 0xad0   : > { %2310 = dma.done.wait (!%p2014_p5), %s1657_s13, 128  }
 0xad1   : > { %2312 = vsyncadd (!%p2014_p5), %s1657_s13, 4294967168  ;;  %s26_s10 = sadd.s32 1, %s2335_s10   ;;  %s2851_s27 = smov %s2319_s28 }
 0xad2   : > { %p23_p8 = scmp.ge.s32.totalorder %s26_s10, 4   ;;  %s2852_s28 = smov %s2323_s29 }
 0xad3   : > { %s2853_s29 = smov %s2584_s25  ;;  %s2854_s30 = smov %s2331_s9 }
 0xad4   : > { %s2855_s9 = smov %s2857_s26  ;;  %25 = sbr.rel (!%p23_p8) target bundleno = 12 (0xc), region = 133 }
 0xadb   :  { %1662 = vsyncpa [#allocation4], 1 }
 0xadc   :  { %1664 = vsyncpa [#allocation4 + $0x1], 1 }
 0xadd   :  { %1665 = vsyncpa [#allocation7], 1 }
 0xade   :  { %1666 = vsyncpa [#allocation10], 1 }
 0xadf   :  { %1667 = vsyncpa [#allocation5], 1 }
 0xae0   :  { %1669 = vsyncpa [#allocation5 + $0x1], 1 }

</bundles_post_ra>
